<compile_context>
chip_gen: v6e
topology: v6e:2x2x1
jax: 0.10.0
libtpu: 0.0.40
codegen_flags: <defaults>
</compile_context>

<pallas_src>
import functools
import math

import jax
import jax.numpy as jnp
from jax.experimental import pallas as pl
from jax.experimental.pallas import tpu as pltpu

_LANES = 128


def _round_up(x: int, m: int) -> int:
    return ((x + m - 1) // m) * m


def _cdiv(a: int, b: int) -> int:
    return (a + b - 1) // b


def _robust_policy_kernel(x_ref, w0_ref, w_ref, b_ref, out_ref, *, action_dim):
    """One batch tile: 4 chained fused-head matmuls + one lane select."""
    A = action_dim
    x = x_ref[...]                       # [TB, Sp] bf16, state in lanes 0:S
    b = b_ref[...]                       # [8, 128]  f32, rows 0..3 used

    # layer 0: state -> h0 (policy | unc | value hidden); bf16 MXU, f32 acc
    h0 = jnp.dot(x, w0_ref[...], preferred_element_type=jnp.float32) + b[0:1, :]
    h0 = jnp.maximum(h0, 0.0)
    # layer 1 (block-diagonal across the three heads)
    h1 = jnp.dot(h0.astype(jnp.bfloat16), w_ref[0],
                 preferred_element_type=jnp.float32) + b[1:2, :]
    h1 = jnp.maximum(h1, 0.0)
    # layer 2: unc logits at 0:A and A:2A (dup), value at 2A, policy hidden H:2H
    h2 = jnp.dot(h1.astype(jnp.bfloat16), w_ref[1],
                 preferred_element_type=jnp.float32) + b[2:3, :]
    # layer 3: ReLU on all lanes is safe ONLY because w_ref[2] (the fused final
    # policy layer) has nonzero rows exclusively at the policy-hidden lanes.
    h3 = jnp.dot(jnp.maximum(h2, 0.0).astype(jnp.bfloat16), w_ref[2],
                 preferred_element_type=jnp.float32) + b[3:4, :]

    # adjusted logits valid on lanes 0:A (policy at h3[:, :A], unc at h2[:, :A])
    adj = h3 - 0.1 * jnp.abs(h2)

    # out lanes: 0:A = adjusted logits | A:2A = unc logits | 2A = value | rest 0
    lane = jax.lax.broadcasted_iota(jnp.int32, adj.shape, 1)
    out_ref[...] = jnp.where(lane < A, adj,
                             jnp.where(lane < 2 * A + 1, h2, 0.0))


def _linear_params(key, fan_in, fan_out):
    """torch.nn.Linear-style init; weight returned as [in, out]."""
    kw, kb = jax.random.split(key)
    bound = 1.0 / math.sqrt(fan_in)
    w = jax.random.uniform(kw, (fan_in, fan_out), jnp.float32, -bound, bound)
    b = jax.random.uniform(kb, (1, fan_out), jnp.float32, -bound, bound)
    return w, b


def make_params(key, state_dim, action_dim, hidden_dim):
    h2 = hidden_dim // 2
    keys = jax.random.split(key, 10)
    params = []
    # policy_net
    params += _linear_params(keys[0], state_dim, hidden_dim)
    params += _linear_params(keys[1], hidden_dim, hidden_dim)
    params += _linear_params(keys[2], hidden_dim, hidden_dim)
    params += _linear_params(keys[3], hidden_dim, action_dim)
    # uncertainty_net
    params += _linear_params(keys[4], state_dim, h2)
    params += _linear_params(keys[5], h2, h2)
    params += _linear_params(keys[6], h2, action_dim)
    # value_net
    params += _linear_params(keys[7], state_dim, hidden_dim)
    params += _linear_params(keys[8], hidden_dim, h2)
    params += _linear_params(keys[9], h2, 1)
    return params


def pack_params(params, state_dim, action_dim, hidden_dim):
    """Pack 20 per-layer params into:
         w0slab [Sp, 128]     bf16  (layer-0 fused weights, Sp = round_up(S, 8))
         wslab  [3, 128, 128] bf16  (layers 1..3 fused weights)
         bslab  [8, 128]      f32   (rows 0..3 = fused biases of layers 0..3)
    """
    (pw0, pb0, pw1, pb1, pw2, pb2, pw3, pb3,
     uw0, ub0, uw1, ub1, uw2, ub2,
     vw0, vb0, vw1, vb1, vw2, vb2) = params
    S, A, H = state_dim, action_dim, hidden_dim
    H2 = H // 2
    L = _LANES
    Sp = max(8, _round_up(S, 8))
    assert S <= L and 2 * H + H2 <= L and 2 * A + 1 <= H, \
        "packed layout assumes small dims (fits in 128 lanes)"

    w0 = jnp.zeros((Sp, L), jnp.float32)
    w = jnp.zeros((3, L, L), jnp.float32)
    b = jnp.zeros((8, L), jnp.float32)

    # layer 0: x -> h0: policy 0:H | unc H:H+H2 | value H+H2:2H+H2
    w0 = (w0.at[0:S, 0:H].set(pw0)
             .at[0:S, H:H + H2].set(uw0)
             .at[0:S, H + H2:2 * H + H2].set(vw0))
    b = (b.at[0, 0:H].set(pb0[0])
          .at[0, H:H + H2].set(ub0[0])
          .at[0, H + H2:2 * H + H2].set(vb0[0]))

    # layer 1 (block-diag): policy 0:H | unc H:H+H2 | value H+H2:H+2*H2
    w = (w.at[0, 0:H, 0:H].set(pw1)
          .at[0, H:H + H2, H:H + H2].set(uw1)
          .at[0, H + H2:2 * H + H2, H + H2:H + 2 * H2].set(vw1))
    b = (b.at[1, 0:H].set(pb1[0])
          .at[1, H:H + H2].set(ub1[0])
          .at[1, H + H2:H + 2 * H2].set(vb1[0]))

    # layer 2: unc logits at 0:A and A:2A (dup), value at 2A, policy hidden H:2H
    w = (w.at[1, 0:H, H:2 * H].set(pw2)
          .at[1, H:H + H2, 0:A].set(uw2)
          .at[1, H:H + H2, A:2 * A].set(uw2)
          .at[1, H + H2:H + 2 * H2, 2 * A:2 * A + 1].set(vw2))
    b = (b.at[2, H:2 * H].set(pb2[0])
          .at[2, 0:A].set(ub2[0])
          .at[2, A:2 * A].set(ub2[0])
          .at[2, 2 * A:2 * A + 1].set(vb2[0]))

    # layer 3: relu(h2) policy hidden (H:2H) -> policy logits at 0:A
    # (rows outside H:2H MUST stay zero -- see invariant in the kernel)
    w = w.at[2, H:2 * H, 0:A].set(pw3)
    b = b.at[3, 0:A].set(pb3[0])

    return w0.astype(jnp.bfloat16), w.astype(jnp.bfloat16), b


def robust_policy_forward(state, w0slab, wslab, bslab, action_dim,
                          *, tb_max=1024, core_parallel=False):
    """state: [B, S] -> (adjusted_logits [B,A], value [B,1], uncertainty_logits [B,A]).

    tb_max: batch-tile cap; 1024 stays well inside v5e's 16 MiB scoped-VMEM
      default. If you raise it past ~2048, add vmem_limit_bytes explicitly.
    core_parallel: set True on v7x to shard batch tiles across both
      TensorCores (only engaged when the grid has >= 2 steps).
    """
    B, S = state.shape
    L = _LANES
    A = action_dim
    Sp = w0slab.shape[0]
    assert S <= Sp

    # Tile selection with < 1 tile of padding waste (no 2x padding cliff).
    n_tiles = _cdiv(B, tb_max)
    TB = min(tb_max, _round_up(_cdiv(B, n_tiles), 8))
    n_steps = _cdiv(B, TB)
    Bp = n_steps * TB

    x = state.astype(jnp.bfloat16)
    if Bp != B or Sp != S:
        x = jnp.zeros((Bp, Sp), jnp.bfloat16).at[:B, :S].set(x)

    dims = (pltpu.CORE_PARALLEL,) if (core_parallel and n_steps >= 2) \
        else ("parallel",)

    kernel = functools.partial(_robust_policy_kernel, action_dim=A)
    out = pl.pallas_call(
        kernel,
        out_shape=jax.ShapeDtypeStruct((Bp, L), jnp.float32),
        grid=(n_steps,),
        in_specs=[
            pl.BlockSpec((TB, Sp), lambda i: (i, 0)),        # state tile (bf16)
            pl.BlockSpec((Sp, L), lambda i: (0, 0)),         # layer-0 weights (resident)
            pl.BlockSpec((3, L, L), lambda i: (0, 0, 0)),    # layers 1..3 weights (resident)
            pl.BlockSpec((8, L), lambda i: (0, 0)),          # biases (resident)
        ],
        out_specs=pl.BlockSpec((TB, L), lambda i: (i, 0)),
        compiler_params=pltpu.CompilerParams(dimension_semantics=dims),
    )(x, w0slab, wslab, bslab)

    # Padded rows B..Bp carry bias-propagated garbage; they are sliced off here.
    adj = out[:B, 0:A]
    unc = out[:B, A:2 * A]
    val = out[:B, 2 * A:2 * A + 1]
    return adj, val, unc


def reference_forward(state, params):
    """Pure-JAX f32 reference for correctness checking (unpacked params)."""
    (pw0, pb0, pw1, pb1, pw2, pb2, pw3, pb3,
     uw0, ub0, uw1, ub1, uw2, ub2,
     vw0, vb0, vw1, vb1, vw2, vb2) = params
    relu = lambda x: jnp.maximum(x, 0.0)
    h = relu(state @ pw0 + pb0)
    h = relu(h @ pw1 + pb1)
    h = relu(h @ pw2 + pb2)
    policy = h @ pw3 + pb3
    u = relu(state @ uw0 + ub0)
    u = relu(u @ uw1 + ub1)
    unc = u @ uw2 + ub2
    v = relu(state @ vw0 + vb0)
    v = relu(v @ vw1 + vb1)
    val = v @ vw2 + vb2
    return policy - 0.1 * jnp.abs(unc), val, unc


if __name__ == "__main__":
    key = jax.random.PRNGKey(0)
    k_state, k_state2, k_params = jax.random.split(key, 3)

    # Small shapes consistent with the module's forward.
    batch = 8
    state_dim = 16
    action_dim = 8
    hidden_dim = 32

    state = jax.random.normal(k_state, (batch, state_dim), jnp.float32)
    params = make_params(k_params, state_dim, action_dim, hidden_dim)
    w0slab, wslab, bslab = pack_params(params, state_dim, action_dim, hidden_dim)

    adj, val, unc = robust_policy_forward(state, w0slab, wslab, bslab, action_dim)
    jax.block_until_ready((adj, val, unc))

    # Correctness vs. pure-JAX f32 reference. The kernel uses bf16 weights and
    # activations (f32 accumulation), so the tolerance is loosened accordingly.
    ref_adj, ref_val, ref_unc = reference_forward(state, params)
    assert adj.shape == (batch, action_dim) and val.shape == (batch, 1)
    assert jnp.allclose(adj, ref_adj, atol=5e-2, rtol=5e-2), "adjusted_logits mismatch"
    assert jnp.allclose(val, ref_val, atol=5e-2, rtol=5e-2), "value mismatch"
    assert jnp.allclose(unc, ref_unc, atol=5e-2, rtol=5e-2), "uncertainty mismatch"

    # Second check with a non-multiple-of-8 batch to exercise the padding path.
    state2 = jax.random.normal(k_state2, (37, state_dim), jnp.float32)
    adj2, val2, unc2 = robust_policy_forward(state2, w0slab, wslab, bslab, action_dim)
    jax.block_until_ready((adj2, val2, unc2))
    ref_adj2, ref_val2, ref_unc2 = reference_forward(state2, params)
    assert jnp.allclose(adj2, ref_adj2, atol=5e-2, rtol=5e-2), "adjusted_logits mismatch (padded)"
    assert jnp.allclose(val2, ref_val2, atol=5e-2, rtol=5e-2), "value mismatch (padded)"
    assert jnp.allclose(unc2, ref_unc2, atol=5e-2, rtol=5e-2), "uncertainty mismatch (padded)"

    print("KERNEL_OK")
</pallas_src>

<mosaic_0001>
module attributes {stable_mosaic.version = 11 : i64} {
  func.func @_robust_policy_kernel(%arg0: i32, %arg1: memref<8x16xbf16, #tpu.memory_space<vmem>>, %arg2: memref<16x128xbf16, #tpu.memory_space<vmem>>, %arg3: memref<3x128x128xbf16, #tpu.memory_space<vmem>>, %arg4: memref<8x128xf32, #tpu.memory_space<vmem>>, %arg5: memref<8x128xf32, #tpu.memory_space<vmem>>) attributes {dimension_semantics = [#tpu.dimension_semantics<parallel>], iteration_bounds = array<i64: 1>, scalar_prefetch = 0 : i64, scratch_operands = 0 : i64, tpu.core_type = #tpu.core_type<tc>, window_params = [{transform_indices = @transform_0, window_bounds = array<i64: 8, 16>}, {pipeline_mode = #tpu.pipeline_mode<synchronous>, transform_indices = @transform_1, window_bounds = array<i64: 16, 128>}, {pipeline_mode = #tpu.pipeline_mode<synchronous>, transform_indices = @transform_2, window_bounds = array<i64: 3, 128, 128>}, {pipeline_mode = #tpu.pipeline_mode<synchronous>, transform_indices = @transform_3, window_bounds = array<i64: 8, 128>}, {transform_indices = @transform_4, window_bounds = array<i64: 8, 128>}]} {
    %c0 = arith.constant 0 : index
    %c0_0 = arith.constant 0 : index
    %0 = vector.load %arg1[%c0, %c0_0] : memref<8x16xbf16, #tpu.memory_space<vmem>>, vector<8x16xbf16>
    %c0_1 = arith.constant 0 : index
    %c0_2 = arith.constant 0 : index
    %1 = vector.load %arg4[%c0_1, %c0_2] : memref<8x128xf32, #tpu.memory_space<vmem>>, vector<8x128xf32>
    %c0_3 = arith.constant 0 : index
    %c0_4 = arith.constant 0 : index
    %2 = vector.load %arg2[%c0_3, %c0_4] : memref<16x128xbf16, #tpu.memory_space<vmem>>, vector<16x128xbf16>
    %cst = arith.constant dense<0.000000e+00> : vector<8x128xf32>
    %3 = tpu.matmul %0, %2, %cst {dimension_numbers = #tpu.dot_dimension_numbers<[1], [0], [0], [1], [0, 0, 1, 1], [], []>} : vector<8x16xbf16>, vector<16x128xbf16>, vector<8x128xf32> -> vector<8x128xf32>
    %4 = vector.extract_strided_slice %1 {offsets = [0, 0], sizes = [1, 128], strides = [1, 1]} : vector<8x128xf32> to vector<1x128xf32>
    %5 = vector.broadcast %4 : vector<1x128xf32> to vector<8x128xf32>
    %6 = arith.addf %3, %5 : vector<8x128xf32>
    %cst_5 = arith.constant 0.000000e+00 : f32
    %7 = vector.broadcast %cst_5 : f32 to vector<8x128xf32>
    %8 = arith.maximumf %6, %7 : vector<8x128xf32>
    %9 = arith.truncf %8 : vector<8x128xf32> to vector<8x128xbf16>
    %c0_6 = arith.constant 0 : index
    %c0_7 = arith.constant 0 : index
    %c0_8 = arith.constant 0 : index
    %10 = vector.load %arg3[%c0_6, %c0_7, %c0_8] : memref<3x128x128xbf16, #tpu.memory_space<vmem>>, vector<1x128x128xbf16>
    %11 = vector.shape_cast %10 : vector<1x128x128xbf16> to vector<128x128xbf16>
    %cst_9 = arith.constant dense<0.000000e+00> : vector<8x128xf32>
    %12 = tpu.matmul %9, %11, %cst_9 {dimension_numbers = #tpu.dot_dimension_numbers<[1], [0], [0], [1], [0, 0, 1, 1], [], []>} : vector<8x128xbf16>, vector<128x128xbf16>, vector<8x128xf32> -> vector<8x128xf32>
    %13 = vector.extract_strided_slice %1 {offsets = [1, 0], sizes = [1, 128], strides = [1, 1]} : vector<8x128xf32> to vector<1x128xf32>
    %14 = vector.broadcast %13 : vector<1x128xf32> to vector<8x128xf32>
    %15 = arith.addf %12, %14 : vector<8x128xf32>
    %cst_10 = arith.constant 0.000000e+00 : f32
    %16 = vector.broadcast %cst_10 : f32 to vector<8x128xf32>
    %17 = arith.maximumf %15, %16 : vector<8x128xf32>
    %18 = arith.truncf %17 : vector<8x128xf32> to vector<8x128xbf16>
    %c1 = arith.constant 1 : index
    %c0_11 = arith.constant 0 : index
    %c0_12 = arith.constant 0 : index
    %19 = vector.load %arg3[%c1, %c0_11, %c0_12] : memref<3x128x128xbf16, #tpu.memory_space<vmem>>, vector<1x128x128xbf16>
    %20 = vector.shape_cast %19 : vector<1x128x128xbf16> to vector<128x128xbf16>
    %cst_13 = arith.constant dense<0.000000e+00> : vector<8x128xf32>
    %21 = tpu.matmul %18, %20, %cst_13 {dimension_numbers = #tpu.dot_dimension_numbers<[1], [0], [0], [1], [0, 0, 1, 1], [], []>} : vector<8x128xbf16>, vector<128x128xbf16>, vector<8x128xf32> -> vector<8x128xf32>
    %22 = vector.extract_strided_slice %1 {offsets = [2, 0], sizes = [1, 128], strides = [1, 1]} : vector<8x128xf32> to vector<1x128xf32>
    %23 = vector.broadcast %22 : vector<1x128xf32> to vector<8x128xf32>
    %24 = arith.addf %21, %23 : vector<8x128xf32>
    %cst_14 = arith.constant 0.000000e+00 : f32
    %25 = vector.broadcast %cst_14 : f32 to vector<8x128xf32>
    %26 = arith.maximumf %24, %25 : vector<8x128xf32>
    %27 = arith.truncf %26 : vector<8x128xf32> to vector<8x128xbf16>
    %c2 = arith.constant 2 : index
    %c0_15 = arith.constant 0 : index
    %c0_16 = arith.constant 0 : index
    %28 = vector.load %arg3[%c2, %c0_15, %c0_16] : memref<3x128x128xbf16, #tpu.memory_space<vmem>>, vector<1x128x128xbf16>
    %29 = vector.shape_cast %28 : vector<1x128x128xbf16> to vector<128x128xbf16>
    %cst_17 = arith.constant dense<0.000000e+00> : vector<8x128xf32>
    %30 = tpu.matmul %27, %29, %cst_17 {dimension_numbers = #tpu.dot_dimension_numbers<[1], [0], [0], [1], [0, 0, 1, 1], [], []>} : vector<8x128xbf16>, vector<128x128xbf16>, vector<8x128xf32> -> vector<8x128xf32>
    %31 = vector.extract_strided_slice %1 {offsets = [3, 0], sizes = [1, 128], strides = [1, 1]} : vector<8x128xf32> to vector<1x128xf32>
    %32 = vector.broadcast %31 : vector<1x128xf32> to vector<8x128xf32>
    %33 = arith.addf %30, %32 : vector<8x128xf32>
    %34 = math.absf %24 : vector<8x128xf32>
    %cst_18 = arith.constant 1.000000e-01 : f32
    %35 = vector.broadcast %cst_18 : f32 to vector<8x128xf32>
    %36 = arith.mulf %35, %34 : vector<8x128xf32>
    %37 = arith.subf %33, %36 : vector<8x128xf32>
    %38 = tpu.iota {dimensions = array<i32: 1>} : vector<8x128xi32>
    %c8_i32 = arith.constant 8 : i32
    %39 = vector.broadcast %c8_i32 : i32 to vector<8x128xi32>
    %40 = arith.cmpi slt, %38, %39 : vector<8x128xi32>
    %c17_i32 = arith.constant 17 : i32
    %41 = vector.broadcast %c17_i32 : i32 to vector<8x128xi32>
    %42 = arith.cmpi slt, %38, %41 : vector<8x128xi32>
    %cst_19 = arith.constant 0.000000e+00 : f32
    %43 = vector.broadcast %cst_19 : f32 to vector<8x128xf32>
    %44 = arith.select %42, %24, %43 : vector<8x128xi1>, vector<8x128xf32>
    %45 = arith.select %40, %37, %44 : vector<8x128xi1>, vector<8x128xf32>
    %c0_20 = arith.constant 0 : index
    %c0_21 = arith.constant 0 : index
    %46 = vector.load %arg5[%c0_20, %c0_21] : memref<8x128xf32, #tpu.memory_space<vmem>>, vector<8x128xf32>
    tpu.vector_store %arg5[%c0_20, %c0_21], %45 {strides = array<i32>} : memref<8x128xf32, #tpu.memory_space<vmem>>, vector<8x128xf32>,
    return
  }
  func.func @transform_0(%arg0: i32) -> (i32, i32) {
    %c0_i32 = arith.constant 0 : i32
    %c0_i32_0 = arith.constant 0 : i32
    return %arg0, %c0_i32 : i32, i32
  }
  func.func @transform_1(%arg0: i32) -> (i32, i32) {
    %c0_i32 = arith.constant 0 : i32
    %c0_i32_0 = arith.constant 0 : i32
    %c0_i32_1 = arith.constant 0 : i32
    return %c0_i32, %c0_i32_0 : i32, i32
  }
  func.func @transform_2(%arg0: i32) -> (i32, i32, i32) {
    %c0_i32 = arith.constant 0 : i32
    %c0_i32_0 = arith.constant 0 : i32
    %c0_i32_1 = arith.constant 0 : i32
    %c0_i32_2 = arith.constant 0 : i32
    return %c0_i32, %c0_i32_0, %c0_i32_1 : i32, i32, i32
  }
  func.func @transform_3(%arg0: i32) -> (i32, i32) {
    %c0_i32 = arith.constant 0 : i32
    %c0_i32_0 = arith.constant 0 : i32
    %c0_i32_1 = arith.constant 0 : i32
    return %c0_i32, %c0_i32_0 : i32, i32
  }
  func.func @transform_4(%arg0: i32) -> (i32, i32) {
    %c0_i32 = arith.constant 0 : i32
    %c0_i32_0 = arith.constant 0 : i32
    return %arg0, %c0_i32 : i32, i32
  }
}

</mosaic_0001>

<bundles_post_ra>
// kernel: tpu_custom_call.1
= control target key start
LH: loop header
LB: loop body
LE: loop exit
PB: predicated region body
PF: predicated region fallthrough
CT: control target
= control target key end

     0   :  { %9 = vsyncpa [#allocation3], 0  ;;  %s840_s0 = inlined_call_operand.hbm [shape: bf16[8,16], index: 0, kind: input, shape index: {}]   ;;  %s841_s1 = inlined_call_operand.hbm [shape: bf16[16,128], index: 1, kind: input, shape index: {}]   ;;  %s842_s2 = inlined_call_operand.hbm [shape: bf16[3,128,128], index: 2, kind: input, shape index: {}]   ;;  %s843_s3 = inlined_call_operand.hbm [shape: f32[8,128], index: 3, kind: input, shape index: {}]   ;;  %s844_s4 = inlined_call_operand.hbm [shape: f32[8,128], index: 4, kind: output, shape index: {}]  }
   0x1   :  { %10 = vsyncpa [#allocation6], 0 }
   0x2   :  { %11 = vsyncpa [#allocation9], 0 }
   0x3   :  { %12 = vsyncpa [#allocation4], 0  ;;  %s750_s15 = smov [#allocation5]  }
   0x4   :  { %s28_s16 = sshll.u32 %s750_s15, 4  ;;  %s29_s16 = int_to_ptr.vmem [resolvable:$true] %s28_s16 }
   0x5   :  { %s650_s17 = scalar_lea.vmem %s29_s16, 128  ;;  %p655_p1 = scmp.lt.s32.totalorder %s29_s16, %s29_s16 }
   0x6   :  { %p651_p0 = scmp.ne.s32.totalorder %s29_s16, %s650_s17  ;;  %p656_p2 = scmp.lt.s32.totalorder %s650_s17, %s650_s17 }
   0x8   :  { %p657_p3 = por %p656_p2, %p655_p1 }
   0xa   :  { %p658_p4 = pnand %p657_p3, %p651_p0 }
   0xc   :  { %661 = shalt.err (!%p658_p4)
}
   0xd   :  { %s751_s18 = smov 64   ;;  %s752_s19 = smov 4  }
   0xe   :  { %34 = dma.hbm_to_vmem [thread:$0]  %s841_s1, 128, %s29_s16, [#allocation6], %s751_s18, %s751_s18, %s752_s19  }
   0xf   :  { %s753_s22 = smov [#allocation2]   ;;  %s754_s24 = smov [#allocation7]  }
  0x10   :  { %s19_s23 = sshll.u32 %s753_s22, 4  ;;  %s40_s25 = sshll.u32 %s754_s24, 4  ;;  %s20_s23 = int_to_ptr.vmem [resolvable:$true] %s19_s23  ;;  %s41_s25 = int_to_ptr.vmem [resolvable:$true] %s40_s25 }
  0x11   :  { %s670_s26 = scalar_lea.vmem %s20_s23, 64  ;;  %p675_p6 = scmp.lt.s32.totalorder %s20_s23, %s20_s23 }
  0x12   :  { %p671_p5 = scmp.ne.s32.totalorder %s20_s23, %s670_s26  ;;  %p676_p7 = scmp.lt.s32.totalorder %s670_s26, %s670_s26 }
  0x14   :  { %p677_p8 = por %p676_p7, %p675_p6 }
  0x16   :  { %p678_p9 = pnand %p677_p8, %p671_p5 }
  0x18   :  { %681 = shalt.err (!%p678_p9)
}
  0x19   :  { %22 = dma.hbm_to_vmem [thread:$0]  %s840_s0, 64, %s20_s23, [#allocation3]  }
  0x1a   :  { %s690_s29 = scalar_lea.vmem %s41_s25, 3072  ;;  %p695_p11 = scmp.lt.s32.totalorder %s41_s25, %s41_s25 }
  0x1b   :  { %p691_p10 = scmp.ne.s32.totalorder %s41_s25, %s690_s29  ;;  %p696_p12 = scmp.lt.s32.totalorder %s690_s29, %s690_s29 }
  0x1d   :  { %p697_p13 = por %p696_p12, %p695_p11 }
  0x1f   :  { %p698_p0 = pnand %p697_p13, %p691_p10 }
  0x21   :  { %701 = shalt.err (!%p698_p0)
}
  0x22   :  { %46 = dma.hbm_to_vmem [thread:$0]  %s842_s2, 3072, %s41_s25, [#allocation6], %s751_s18, %s751_s18, %s752_s19  }
  0x23   :  { %s755_s5 = smov [#allocation8]  }
  0x24   :  { %s53_s6 = sshll.u32 %s755_s5, 4  ;;  %s54_s6 = int_to_ptr.vmem [resolvable:$true] %s53_s6 }
  0x25   :  { %s710_s7 = scalar_lea.vmem %s54_s6, 128  ;;  %p715_p2 = scmp.lt.s32.totalorder %s54_s6, %s54_s6 }
  0x26   :  { %p711_p1 = scmp.ne.s32.totalorder %s54_s6, %s710_s7  ;;  %p716_p3 = scmp.lt.s32.totalorder %s710_s7, %s710_s7 }
  0x28   :  { %p717_p4 = por %p716_p3, %p715_p2 }
  0x2a   :  { %p718_p5 = pnand %p717_p4, %p711_p1 }
  0x2c   :  { %721 = shalt.err (!%p718_p5)
}
  0x2d   :  { %56 = dma.hbm_to_vmem [thread:$0]  %s843_s3, 128, %s54_s6, [#allocation9]  }
  0x2e   :  { %742 = dma.done.wait [#allocation3], 64  }
  0x2f   :  { %743 = vsyncadd [#allocation3], 4294967232 }
  0x30   :  { %744 = dma.done.wait [#allocation6], 3200  }
  0x31   :  { %745 = vsyncadd [#allocation6], 4294964096 }
  0x32   :  { %746 = dma.done.wait [#allocation9], 128  }
  0x33   :  { %747 = vsyncadd [#allocation9], 4294967168  ;;  %v756_v0 = vmov 0.0   ;;  %vm757_vm0 = vmmov 0   ;;  %v617_v1 = vld [vmem:[#allocation5] sm:$0xff]   ;;  %vm84_vm1 = vcmask 130048   ;;  %v74_v17 = vlaneseq }
  0x34   :  { %542 = vmatprep.subr.bf16.mxu0 %v756_v0  ;;  %544 = vmatprep.mubr.msk.bf16.mxu0 %vm757_vm0, %v756_v0  ;;  %v70_v2 = vld [vmem:[#allocation2] sm:$0xf]  ;;  %v618_v3 = vld [vmem:[#allocation7 + $0x38] sm:$0xff]   ;;  %v620_v5 = vld [vmem:[#allocation7 + $0x28] sm:$0xff]   ;;  %s758_s2 = smov [#allocation10]  }
  0x35   :  { %548 = vmatprep.subr.bf16.mxu1 %v756_v0  ;;  %564 = vmatprep.mubr.msk.bf16.mxu1 %vm757_vm0, %v756_v0  ;;  %v619_v4 = vld [vmem:[#allocation7 + $0x30] sm:$0xff]   ;;  %v621_v6 = vld [vmem:[#allocation7 + $0x20] sm:$0xff]   ;;  %v622_v7 = vld [vmem:[#allocation7 + $0x18] sm:$0xff]   ;;  %v820_v18 = vshrl.u32 %v74_v17, 7  ;;  %v464_v60 = vand.u32 127, %v74_v17  ;;  %s476_s3 = sshll.u32 %s758_s2, 4  ;;  %s477_s3 = int_to_ptr.vmem [resolvable:$true] %s476_s3 }
  0x36   :  { %543 = vmatpush3.bf16.msra.mxu0 %v617_v1  ;;  %549 = vmatpush3.bf16.msra.mxu1 %v618_v3  ;;  %v623_v8 = vld [vmem:[#allocation7 + $0x10] sm:$0xff]   ;;  %v624_v9 = vld [vmem:[#allocation7 + $0x8] sm:$0xff]   ;;  %v625_v10 = vld [vmem:[#allocation7] sm:$0xff]   ;;  %s722_s9 = scalar_lea.vmem %s477_s3, 128  ;;  %p727_p7 = scmp.lt.s32.totalorder %s477_s3, %s477_s3 }
  0x37   :  { %568 = vmatprep.subr.bf16.mxu0 %v756_v0  ;;  %550 = vmatprep.subr.bf16.mxu1 %v756_v0  ;;  %v626_v11 = vld [vmem:[#allocation7 + $0x78] sm:$0xff]   ;;  %v627_v12 = vld [vmem:[#allocation7 + $0x70] sm:$0xff]   ;;  %v628_v13 = vld [vmem:[#allocation7 + $0x68] sm:$0xff]   ;;  %v76_v19 = vsub.s32 0, %v820_v18  ;;  %v148_v37 = vsub.s32 1, %v820_v18  ;;  %v259_v48 = vsub.s32 2, %v820_v18  ;;  %p723_p6 = scmp.ne.s32.totalorder %s477_s3, %s722_s9  ;;  %p728_p8 = scmp.lt.s32.totalorder %s722_s9, %s722_s9 }
  0x38   :  { %v629_v14 = vld [vmem:[#allocation7 + $0x60] sm:$0xff]   ;;  %v630_v15 = vld [vmem:[#allocation7 + $0x58] sm:$0xff]   ;;  %v631_v16 = vld [vmem:[#allocation7 + $0x50] sm:$0xff]   ;;  %v370_v57 = vsub.s32 3, %v820_v18  ;;  %vm466_vm2 = vcmp.lt.s32.totalorder %v464_v60, 17  ;;  %vm465_vm3 = vcmp.lt.s32.totalorder %v464_v60, 8 }
  0x39   :  { %545 = vmatmul.mubr.msk.bf16.vlgmr.msra.gmra.mxu0 %vm84_vm1, %v70_v2  ;;  %v71_v20 = vld [vmem:[#allocation8] sm:$0xff]  ;;  %v632_v29 = vld [vmem:[#allocation7 + $0x48] sm:$0xff]   ;;  %v634_v31 = vld [vmem:[#allocation7 + $0xb8] sm:$0xff]   ;;  %p729_p9 = por %p728_p8, %p727_p7 }
  0x3a   :  { %584 = vmatprep.mubr.msk.bf16.mxu0 %vm757_vm0, %v756_v0  ;;  %551 = vmatpush3.bf16.msra.mxu1 %v619_v4  ;;  %v77_v21 = vrot.slane %v71_v20, %v76_v19  ;;  %v633_v30 = vld [vmem:[#allocation7 + $0x40] sm:$0xff]   ;;  %v635_v32 = vld [vmem:[#allocation7 + $0xb0] sm:$0xff]   ;;  %v636_v33 = vld [vmem:[#allocation7 + $0xa8] sm:$0xff]   ;;  %v149_v38 = vrot.slane %v71_v20, %v148_v37  ;;  %v260_v49 = vrot.slane %v71_v20, %v259_v48 }
  0x3b   :  { %552 = vmatprep.subr.bf16.mxu1 %v756_v0  ;;  %569 = vmatpush3.bf16.msra.mxu0 %v626_v11  ;;  %v637_v34 = vld [vmem:[#allocation7 + $0xa0] sm:$0xff]   ;;  %v638_v35 = vld [vmem:[#allocation7 + $0x98] sm:$0xff]   ;;  %v639_v36 = vld [vmem:[#allocation7 + $0x90] sm:$0xff]   ;;  %v371_v58 = vrot.slane %v71_v20, %v370_v57  ;;  %p730_p10 = pnand %p729_p9, %p723_p6 }
  0x3c   :  { %570 = vmatprep.subr.bf16.mxu0 %v756_v0  ;;  %v640_v46 = vld [vmem:[#allocation7 + $0x88] sm:$0xff]   ;;  %v641_v47 = vld [vmem:[#allocation7 + $0x80] sm:$0xff]  }
  0x3e   :  { %553 = vmatpush3.bf16.msra.mxu1 %v620_v5 }
  0x3f   :  { %554 = vmatprep.subr.bf16.mxu1 %v756_v0  ;;  %571 = vmatpush3.bf16.msra.mxu0 %v627_v12 }
  0x40   :  { %572 = vmatprep.subr.bf16.mxu0 %v756_v0 }
  0x42   :  { %555 = vmatpush3.bf16.msra.mxu1 %v621_v6 }
  0x43   :  { %556 = vmatprep.subr.bf16.mxu1 %v756_v0  ;;  %573 = vmatpush3.bf16.msra.mxu0 %v628_v13 }
  0x44   :  { %574 = vmatprep.subr.bf16.mxu0 %v756_v0 }
  0x46   :  { %557 = vmatpush3.bf16.msra.mxu1 %v622_v7 }
  0x47   :  { %558 = vmatprep.subr.bf16.mxu1 %v756_v0  ;;  %575 = vmatpush3.bf16.msra.mxu0 %v629_v14 }
  0x48   :  { %576 = vmatprep.subr.bf16.mxu0 %v756_v0 }
  0x4a   :  { %559 = vmatpush3.bf16.msra.mxu1 %v623_v8 }
  0x4b   :  { %560 = vmatprep.subr.bf16.mxu1 %v756_v0  ;;  %577 = vmatpush3.bf16.msra.mxu0 %v630_v15 }
  0x4c   :  { %578 = vmatprep.subr.bf16.mxu0 %v756_v0 }
  0x4e   :  { %561 = vmatpush3.bf16.msra.mxu1 %v624_v9 }
  0x4f   :  { %562 = vmatprep.subr.bf16.mxu1 %v756_v0  ;;  %579 = vmatpush3.bf16.msra.mxu0 %v631_v16 }
  0x50   :  { %580 = vmatprep.subr.bf16.mxu0 %v756_v0 }
  0x52   :  { %563 = vmatpush3.bf16.msra.mxu1 %v625_v10 }
  0x53   :  { %588 = vmatprep.subr.bf16.mxu1 %v756_v0  ;;  %581 = vmatpush3.bf16.msra.mxu0 %v632_v29 }
  0x54   :  { %582 = vmatprep.subr.bf16.mxu0 %v756_v0 }
  0x57   :  { %583 = vmatpush3.bf16.msra.mxu0 %v633_v30 }
  0xf9   :  { %v122_v22 = vpop.f32.mrf.mxu0 }
  0xfa   :  { %v123_v23 = vadd.f32 %v122_v22, %v77_v21 }
  0xfb   :  { %v546_v24 = vpop.f32.mrf.mxu0 }
  0xfc   :  { %v128_v25 = vmax.f32 %v123_v23, 0.0 }
  0xfd   :  { %v125_v26 = vpop.f32.mrf.mxu0 }
  0xfe   :  { %v129_v27 = vpack.c.bf16 %v128_v25, %v128_v25 }
  0xff   :  { %v547_v28 = vpop.f32.mrf.mxu0 }
 0x100   :  { %565 = vmatmul.mubr.bf16.vlgmr.msra.gmra.mxu1 %v129_v27 }
 0x101   :  { %604 = vmatprep.mubr.msk.bf16.mxu1 %vm757_vm0, %v756_v0  ;;  %589 = vmatpush3.bf16.msra.mxu1 %v634_v31 }
 0x102   :  { %590 = vmatprep.subr.bf16.mxu1 %v756_v0 }
 0x105   :  { %591 = vmatpush3.bf16.msra.mxu1 %v635_v32 }
 0x106   :  { %592 = vmatprep.subr.bf16.mxu1 %v756_v0 }
 0x109   :  { %593 = vmatpush3.bf16.msra.mxu1 %v636_v33 }
 0x10a   :  { %594 = vmatprep.subr.bf16.mxu1 %v756_v0 }
 0x10d   :  { %595 = vmatpush3.bf16.msra.mxu1 %v637_v34 }
 0x10e   :  { %596 = vmatprep.subr.bf16.mxu1 %v756_v0 }
 0x111   :  { %597 = vmatpush3.bf16.msra.mxu1 %v638_v35 }
 0x112   :  { %598 = vmatprep.subr.bf16.mxu1 %v756_v0 }
 0x115   :  { %599 = vmatpush3.bf16.msra.mxu1 %v639_v36 }
 0x116   :  { %600 = vmatprep.subr.bf16.mxu1 %v756_v0 }
 0x119   :  { %601 = vmatpush3.bf16.msra.mxu1 %v640_v46 }
 0x11a   :  { %602 = vmatprep.subr.bf16.mxu1 %v756_v0 }
 0x11d   :  { %603 = vmatpush3.bf16.msra.mxu1 %v641_v47 }
 0x1c0   :  { %v232_v39 = vpop.f32.mrf.mxu1 }
 0x1c1   :  { %v233_v40 = vadd.f32 %v232_v39, %v149_v38 }
 0x1c2   :  { %v566_v41 = vpop.f32.mrf.mxu1 }
 0x1c3   :  { %v238_v42 = vmax.f32 %v233_v40, 0.0 }
 0x1c4   :  { %v235_v43 = vpop.f32.mrf.mxu1 }
 0x1c5   :  { %v239_v44 = vpack.c.bf16 %v238_v42, %v238_v42 }
 0x1c6   :  { %v567_v45 = vpop.f32.mrf.mxu1 }
 0x1c7   :  { %585 = vmatmul.mubr.bf16.vlgmr.msra.gmra.mxu0 %v239_v44 }
 0x287   :  { %v343_v50 = vpop.f32.mrf.mxu0 }
 0x288   :  { %v344_v51 = vadd.f32 %v343_v50, %v260_v49 }
 0x289   :  { %v586_v52 = vpop.f32.mrf.mxu0 }
 0x28a   :  { %v349_v53 = vmax.f32 %v344_v51, 0.0  ;;  %v460_v59 = vand.u32 2147483647, %v344_v51  ;;  %v467_v3 = vsel %vm466_vm2, %v344_v51, 0.0 }
 0x28b   :  { %v346_v54 = vpop.f32.mrf.mxu0 }
 0x28c   :  { %v350_v55 = vpack.c.bf16 %v349_v53, %v349_v53  ;;  %v461_v63 = vmul.f32 0.1, %v460_v59 }
 0x28d   :  { %v587_v56 = vpop.f32.mrf.mxu0 }
 0x28e   :  { %605 = vmatmul.mubr.bf16.vlgmr.msra.gmra.mxu1 %v350_v55 }
 0x34e   :  { %v454_v61 = vpop.f32.mrf.mxu1 }
 0x34f   :  { %v455_v62 = vadd.f32 %v454_v61, %v371_v58 }
 0x350   :  { %v606_v0 = vpop.f32.mrf.mxu1 }
 0x351   :  { %v462_v1 = vsub.f32 %v455_v62, %v461_v63 }
 0x352   :  { %v457_v2 = vpop.f32.mrf.mxu1 }
 0x353   :  { %v468_v4 = vsel %vm465_vm3, %v462_v1, %v467_v3 }
 0x354   :  { %v607_v5 = vpop.f32.mrf.mxu1  ;;  %469 = vst [vmem:[#allocation10] sm:$0xff] %v468_v4 }
 0x355   :  { %733 = shalt.err (!%p730_p10)
}
 0x356   :  { %479 = dma.vmem_to_hbm [thread:$0]  %s477_s3, 128, %s844_s4, [#allocation4]  }
 0x357   :  { %748 = dma.done.wait [#allocation4], 128  }
 0x358   :  { %749 = vsyncadd [#allocation4], 4294967168 }
 0x359   :  { %483 = vsyncpa [#allocation3], 1 }
 0x35a   :  { %484 = vsyncpa [#allocation6], 1 }
 0x35b   :  { %485 = vsyncpa [#allocation9], 1 }
 0x35c   :  { %486 = vsyncpa [#allocation4], 1 }

</bundles_post_ra>
